<compile_context>
chip_gen: v7x
topology: tpu7x:2x2x1
jax: 0.10.0
libtpu: 0.0.40
codegen_flags: <defaults>
</compile_context>

<pallas_src>
import functools

import jax
import jax.numpy as jnp
from jax import lax
from jax.experimental import pallas as pl
from jax.experimental.pallas import tpu as pltpu

LAYER_NORM_EPS = 1e-12  # BERT default


def _self_output_kernel(hs_ref, res_ref, w_ref, b_ref, g_ref, beta_ref, o_ref,
                        *, compute_dtype):
    # hs_ref/res_ref: (tm, H) input dtype; w_ref: (H_in, H_out) compute dtype;
    # b/g/beta: (1, H) f32; o_ref: (tm, H) input dtype.
    hs = hs_ref[...].astype(compute_dtype)          # in-kernel cast to MXU dtype
    x = jnp.dot(hs, w_ref[...], preferred_element_type=jnp.float32)
    x = x + b_ref[...]                              # bias (already f32)
    # dropout: identity (eval mode)
    y = x + res_ref[...].astype(jnp.float32)        # residual add
    mean = jnp.mean(y, axis=-1, keepdims=True)
    ctr = y - mean
    var = jnp.mean(ctr * ctr, axis=-1, keepdims=True)
    norm = ctr * lax.rsqrt(var + LAYER_NORM_EPS)
    o_ref[...] = (norm * g_ref[...] + beta_ref[...]).astype(o_ref.dtype)


def _round_up(x, m):
    return (x + m - 1) // m * m


def _choose_tm(tokens, H, in_bytes, cmp_bytes, vmem_limit_bytes):
    # Sublane packing: sub-32-bit tiles pack 16 rows per vreg, f32 packs 8.
    sub = 16 if min(in_bytes, cmp_bytes) < 4 else 8
    # VMEM accounting (per token-row):
    #   hs / res / out tiles, double-buffered pipeline : 2 * 3 * H * in_bytes
    #   f32 matmul/LayerNorm intermediates (estimate)  : 4 * H * 4
    # plus the resident weight (double-buffered by default) and f32 param rows,
    # with 15% headroom left for compiler-internal scratch.
    budget = int(vmem_limit_bytes * 0.85) - 2 * H * H * cmp_bytes - 8 * H * 4
    per_row = 2 * 3 * H * in_bytes + 4 * H * 4
    tm = 1024
    while tm > 128 and tm * per_row > max(budget, per_row):
        tm //= 2
    return max(sub, min(tm, _round_up(tokens, sub)))


def elasticbert_self_output(
    hidden_states, input_tensor, w, b, gamma, beta, *,
    compute_dtype=jnp.bfloat16, tm=None, const_buffer_count=None,
    vmem_limit_bytes=48 * 1024 * 1024,
):
    """Fused dense + residual-add + LayerNorm (ElasticBertSelfOutput, eval mode).

    hidden_states, input_tensor: [B, S, H]; w: [H_out, H_in] (torch Linear).
    compute_dtype: dtype fed to the MXU (accumulation is always f32).
    const_buffer_count: pipeline depth for the resident weight/param blocks
        (pass 1 on v7x to single-buffer them and free VMEM for a larger tm).
    """
    B, S, H = hidden_states.shape
    tokens = B * S
    in_dtype = hidden_states.dtype

    in_bytes = jnp.dtype(in_dtype).itemsize
    cmp_bytes = jnp.dtype(compute_dtype).itemsize
    if tm is None:
        tm = _choose_tm(tokens, H, in_bytes, cmp_bytes, vmem_limit_bytes)
    else:
        sub = 16 if min(in_bytes, cmp_bytes) < 4 else 8
        tm = max(sub, _round_up(min(tm, _round_up(tokens, sub)), sub))

    padded = pl.cdiv(tokens, tm) * tm

    hs2d = hidden_states.reshape(tokens, H)         # no dtype pass in the wrapper
    res2d = input_tensor.reshape(tokens, H)
    if padded != tokens:
        pad = padded - tokens
        hs2d = jnp.pad(hs2d, ((0, pad), (0, 0)))
        res2d = jnp.pad(res2d, ((0, pad), (0, 0)))

    # NOTE: for repeated calls, store the weight pre-transposed (in x out) and
    # pre-cast to avoid re-materializing this tiny transpose on every call.
    w_t = w.T.astype(compute_dtype)                 # (H_in, H_out)
    b_row = b.reshape(1, H).astype(jnp.float32)
    g_row = gamma.reshape(1, H).astype(jnp.float32)
    beta_row = beta.reshape(1, H).astype(jnp.float32)

    const_kwargs = {}
    if const_buffer_count is not None:
        const_kwargs = dict(pipeline_mode=pl.Buffered(const_buffer_count))

    def _const_spec(shape):
        return pl.BlockSpec(shape, lambda i: (0, 0), **const_kwargs)

    kernel = functools.partial(_self_output_kernel, compute_dtype=compute_dtype)

    out2d = pl.pallas_call(
        kernel,
        out_shape=jax.ShapeDtypeStruct((padded, H), in_dtype),
        grid_spec=pltpu.PrefetchScalarGridSpec(
            num_scalar_prefetch=0,
            grid=(padded // tm,),
            in_specs=[
                pl.BlockSpec((tm, H), lambda i: (i, 0)),   # hidden_states tile
                pl.BlockSpec((tm, H), lambda i: (i, 0)),   # residual tile
                _const_spec((H, H)),                       # weight (resident)
                _const_spec((1, H)),                       # bias
                _const_spec((1, H)),                       # LN gamma
                _const_spec((1, H)),                       # LN beta
            ],
            out_specs=pl.BlockSpec((tm, H), lambda i: (i, 0)),
        ),
        compiler_params=pltpu.CompilerParams(
            dimension_semantics=("parallel",),
            vmem_limit_bytes=vmem_limit_bytes,
        ),
    )(hs2d, res2d, w_t, b_row, g_row, beta_row)

    return out2d[:tokens].reshape(B, S, H)


def _reference(hidden_states, input_tensor, w, b, gamma, beta):
    x = jnp.einsum("bsh,oh->bso", hidden_states, w) + b
    y = x + input_tensor
    mean = jnp.mean(y, axis=-1, keepdims=True)
    var = jnp.mean((y - mean) ** 2, axis=-1, keepdims=True)
    return (y - mean) / jnp.sqrt(var + LAYER_NORM_EPS) * gamma + beta


if __name__ == "__main__":
    key = jax.random.PRNGKey(0)
    k1, k2, k3, k4 = jax.random.split(key, 4)

    # Second case has tokens=14 (not a tile multiple) to exercise the padding
    # path; third case uses a lane-full hidden size (H=128).
    for (B, S, H) in [(2, 8, 32), (2, 7, 32), (1, 6, 128)]:
        hidden_states = jax.random.normal(k1, (B, S, H), dtype=jnp.float32)
        input_tensor = jax.random.normal(k2, (B, S, H), dtype=jnp.float32)

        # Deterministic parameter init (synthetic, not a checkpoint).
        w = jax.random.normal(k3, (H, H), dtype=jnp.float32) * (1.0 / jnp.sqrt(H))
        b = jax.random.normal(k4, (H,), dtype=jnp.float32) * 0.02
        gamma = jnp.ones((H,), dtype=jnp.float32)
        beta = jnp.zeros((H,), dtype=jnp.float32)

        ref = _reference(hidden_states, input_tensor, w, b, gamma, beta)

        # f32 MXU path (tight tolerance).
        out_f32 = elasticbert_self_output(
            hidden_states, input_tensor, w, b, gamma, beta,
            compute_dtype=jnp.float32)
        out_f32 = jax.block_until_ready(out_f32)
        assert out_f32.shape == (B, S, H)
        assert jnp.allclose(out_f32, ref, atol=1e-4, rtol=1e-4), "f32 path mismatch"

        # bf16 MXU path (default; f32 accumulation + f32 LayerNorm epilogue).
        out_bf16 = elasticbert_self_output(
            hidden_states, input_tensor, w, b, gamma, beta)
        out_bf16 = jax.block_until_ready(out_bf16)
        assert out_bf16.shape == (B, S, H)
        assert jnp.allclose(out_bf16, ref, atol=5e-2, rtol=5e-2), "bf16 path mismatch"

    print("KERNEL_OK")
</pallas_src>

<mosaic_0001>
module attributes {stable_mosaic.version = 11 : i64} {
  func.func @_self_output_kernel(%arg0: i32, %arg1: memref<16x32xf32, #tpu.memory_space<vmem>>, %arg2: memref<16x32xf32, #tpu.memory_space<vmem>>, %arg3: memref<32x32xf32, #tpu.memory_space<vmem>>, %arg4: memref<1x32xf32, #tpu.memory_space<vmem>>, %arg5: memref<1x32xf32, #tpu.memory_space<vmem>>, %arg6: memref<1x32xf32, #tpu.memory_space<vmem>>, %arg7: memref<16x32xf32, #tpu.memory_space<vmem>>) attributes {dimension_semantics = [#tpu.dimension_semantics<parallel>], iteration_bounds = array<i64: 1>, scalar_prefetch = 0 : i64, scratch_operands = 0 : i64, tpu.core_type = #tpu.core_type<tc>, window_params = [{transform_indices = @transform_0, window_bounds = array<i64: 16, 32>}, {transform_indices = @transform_1, window_bounds = array<i64: 16, 32>}, {pipeline_mode = #tpu.pipeline_mode<synchronous>, transform_indices = @transform_2, window_bounds = array<i64: 32, 32>}, {pipeline_mode = #tpu.pipeline_mode<synchronous>, transform_indices = @transform_3, window_bounds = array<i64: 1, 32>}, {pipeline_mode = #tpu.pipeline_mode<synchronous>, transform_indices = @transform_4, window_bounds = array<i64: 1, 32>}, {pipeline_mode = #tpu.pipeline_mode<synchronous>, transform_indices = @transform_5, window_bounds = array<i64: 1, 32>}, {transform_indices = @transform_6, window_bounds = array<i64: 16, 32>}]} {
    %c0 = arith.constant 0 : index
    %c0_0 = arith.constant 0 : index
    %0 = vector.load %arg1[%c0, %c0_0] : memref<16x32xf32, #tpu.memory_space<vmem>>, vector<16x32xf32>
    %c0_1 = arith.constant 0 : index
    %c0_2 = arith.constant 0 : index
    %1 = vector.load %arg3[%c0_1, %c0_2] : memref<32x32xf32, #tpu.memory_space<vmem>>, vector<32x32xf32>
    %cst = arith.constant dense<0.000000e+00> : vector<16x32xf32>
    %2 = tpu.matmul %0, %1, %cst {dimension_numbers = #tpu.dot_dimension_numbers<[1], [0], [0], [1], [0, 0, 1, 1], [], []>} : vector<16x32xf32>, vector<32x32xf32>, vector<16x32xf32> -> vector<16x32xf32>
    %c0_3 = arith.constant 0 : index
    %c0_4 = arith.constant 0 : index
    %3 = vector.load %arg4[%c0_3, %c0_4] : memref<1x32xf32, #tpu.memory_space<vmem>>, vector<1x32xf32>
    %4 = vector.broadcast %3 : vector<1x32xf32> to vector<16x32xf32>
    %5 = arith.addf %2, %4 : vector<16x32xf32>
    %c0_5 = arith.constant 0 : index
    %c0_6 = arith.constant 0 : index
    %6 = vector.load %arg2[%c0_5, %c0_6] : memref<16x32xf32, #tpu.memory_space<vmem>>, vector<16x32xf32>
    %7 = arith.addf %5, %6 : vector<16x32xf32>
    %cst_7 = arith.constant dense<0.000000e+00> : vector<16xf32>
    %8 = vector.multi_reduction <add>, %7, %cst_7 [1] : vector<16x32xf32> to vector<16xf32>
    %9 = vector.shape_cast %8 : vector<16xf32> to vector<16x1xf32>
    %cst_8 = arith.constant 3.200000e+01 : f32
    %10 = vector.broadcast %cst_8 : f32 to vector<16x1xf32>
    %11 = arith.divf %9, %10 : vector<16x1xf32>
    %12 = vector.broadcast %11 : vector<16x1xf32> to vector<16x32xf32>
    %13 = arith.subf %7, %12 : vector<16x32xf32>
    %14 = arith.mulf %13, %13 : vector<16x32xf32>
    %cst_9 = arith.constant dense<0.000000e+00> : vector<16xf32>
    %15 = vector.multi_reduction <add>, %14, %cst_9 [1] : vector<16x32xf32> to vector<16xf32>
    %16 = vector.shape_cast %15 : vector<16xf32> to vector<16x1xf32>
    %cst_10 = arith.constant 3.200000e+01 : f32
    %17 = vector.broadcast %cst_10 : f32 to vector<16x1xf32>
    %18 = arith.divf %16, %17 : vector<16x1xf32>
    %cst_11 = arith.constant 9.99999996E-13 : f32
    %19 = vector.broadcast %cst_11 : f32 to vector<16x1xf32>
    %20 = arith.addf %18, %19 : vector<16x1xf32>
    %21 = math.rsqrt %20 : vector<16x1xf32>
    %22 = vector.broadcast %21 : vector<16x1xf32> to vector<16x32xf32>
    %23 = arith.mulf %13, %22 : vector<16x32xf32>
    %c0_12 = arith.constant 0 : index
    %c0_13 = arith.constant 0 : index
    %24 = vector.load %arg5[%c0_12, %c0_13] : memref<1x32xf32, #tpu.memory_space<vmem>>, vector<1x32xf32>
    %25 = vector.broadcast %24 : vector<1x32xf32> to vector<16x32xf32>
    %26 = arith.mulf %23, %25 : vector<16x32xf32>
    %c0_14 = arith.constant 0 : index
    %c0_15 = arith.constant 0 : index
    %27 = vector.load %arg6[%c0_14, %c0_15] : memref<1x32xf32, #tpu.memory_space<vmem>>, vector<1x32xf32>
    %28 = vector.broadcast %27 : vector<1x32xf32> to vector<16x32xf32>
    %29 = arith.addf %26, %28 : vector<16x32xf32>
    %c0_16 = arith.constant 0 : index
    %c0_17 = arith.constant 0 : index
    %30 = vector.load %arg7[%c0_16, %c0_17] : memref<16x32xf32, #tpu.memory_space<vmem>>, vector<16x32xf32>
    tpu.vector_store %arg7[%c0_16, %c0_17], %29 {strides = array<i32>} : memref<16x32xf32, #tpu.memory_space<vmem>>, vector<16x32xf32>,
    return
  }
  func.func @transform_0(%arg0: i32) -> (i32, i32) {
    %c0_i32 = arith.constant 0 : i32
    %c0_i32_0 = arith.constant 0 : i32
    return %arg0, %c0_i32 : i32, i32
  }
  func.func @transform_1(%arg0: i32) -> (i32, i32) {
    %c0_i32 = arith.constant 0 : i32
    %c0_i32_0 = arith.constant 0 : i32
    return %arg0, %c0_i32 : i32, i32
  }
  func.func @transform_2(%arg0: i32) -> (i32, i32) {
    %c0_i32 = arith.constant 0 : i32
    %c0_i32_0 = arith.constant 0 : i32
    %c0_i32_1 = arith.constant 0 : i32
    return %c0_i32, %c0_i32_0 : i32, i32
  }
  func.func @transform_3(%arg0: i32) -> (i32, i32) {
    %c0_i32 = arith.constant 0 : i32
    %c0_i32_0 = arith.constant 0 : i32
    %c0_i32_1 = arith.constant 0 : i32
    return %c0_i32, %c0_i32_0 : i32, i32
  }
  func.func @transform_4(%arg0: i32) -> (i32, i32) {
    %c0_i32 = arith.constant 0 : i32
    %c0_i32_0 = arith.constant 0 : i32
    %c0_i32_1 = arith.constant 0 : i32
    return %c0_i32, %c0_i32_0 : i32, i32
  }
  func.func @transform_5(%arg0: i32) -> (i32, i32) {
    %c0_i32 = arith.constant 0 : i32
    %c0_i32_0 = arith.constant 0 : i32
    %c0_i32_1 = arith.constant 0 : i32
    return %c0_i32, %c0_i32_0 : i32, i32
  }
  func.func @transform_6(%arg0: i32) -> (i32, i32) {
    %c0_i32 = arith.constant 0 : i32
    %c0_i32_0 = arith.constant 0 : i32
    return %arg0, %c0_i32 : i32, i32
  }
}

</mosaic_0001>

<bundles_post_ra>
// kernel: tpu_custom_call.1
= control target key start
LH: loop header
LB: loop body
LE: loop exit
PB: predicated region body
PF: predicated region fallthrough
CT: control target
= control target key end

     0   :  { %11 = vsyncpa [#allocation3], 0  ;;  %s488_s0 = inlined_call_operand.hbm [shape: f32[16,32], index: 0, kind: input, shape index: {}]   ;;  %s489_s1 = inlined_call_operand.hbm [shape: f32[16,32], index: 1, kind: input, shape index: {}]   ;;  %s490_s2 = inlined_call_operand.hbm [shape: f32[32,32], index: 2, kind: input, shape index: {}]   ;;  %s491_s3 = inlined_call_operand.vmem [shape: f32[1,32], index: 3, kind: input, shape index: {}]   ;;  %s492_s4 = inlined_call_operand.vmem [shape: f32[1,32], index: 4, kind: input, shape index: {}]   ;;  %s493_s5 = inlined_call_operand.vmem [shape: f32[1,32], index: 5, kind: input, shape index: {}]   ;;  %s494_s6 = inlined_call_operand.hbm [shape: f32[16,32], index: 6, kind: output, shape index: {}]  }
   0x1   :  { %12 = vsyncpa [#allocation6], 0 }
   0x2   :  { %13 = vsyncpa [#allocation4], 0  ;;  %s363_s21 = smov [#allocation5]   ;;  %s364_s23 = smov [#allocation2]  }
   0x3   :  { %s31_s22 = sshll.u32 %s363_s21, 4  ;;  %s19_s24 = sshll.u32 %s364_s23, 4  ;;  %s32_s22 = int_to_ptr.vmem [resolvable:$true] %s31_s22  ;;  %s404_s24 = int_to_ptr.vmem [resolvable:$true] %s19_s24 }
   0x4   :  { %s269_s27 = scalar_lea.hbm %s489_s1, 256 }
   0x5   :  { %p270_p0 = scmp.ne.s32.totalorder %s489_s1, %s269_s27  ;;  %p273_p1 = scmp.lt.u32.totalorder %s269_s27, %s489_s1 }
   0x7   :  { %p275_p2 = pnand %p273_p1, %p270_p0 }
   0x9   :  { %278 = shalt.err (!%p275_p2)
}
   0xa   :  { %s279_s8 = scalar_lea.vmem %s32_s22, 256  ;;  %p284_p4 = scmp.lt.s32.totalorder %s32_s22, %s32_s22 }
   0xb   :  { %p280_p3 = scmp.ne.s32.totalorder %s32_s22, %s279_s8  ;;  %p285_p5 = scmp.lt.s32.totalorder %s279_s8, %s279_s8 }
   0xd   :  { %p286_p6 = por %p285_p5, %p284_p4 }
   0xf   :  { %p287_p7 = pnand %p286_p6, %p280_p3 }
  0x11   :  { %290 = shalt.err (!%p287_p7)
}
  0x12   :  { %s365_s9 = smov 128   ;;  %s366_s10 = smov 8  }
  0x13   :  { %37 = dma.hbm_to_vmem [thread:$0]  %s489_s1, 256, %s32_s22, [#allocation6], %s365_s9, %s365_s9, %s366_s10  }
  0x14   :  { %s291_s15 = scalar_lea.hbm %s488_s0, 256 }
  0x15   :  { %p292_p8 = scmp.ne.s32.totalorder %s488_s0, %s291_s15  ;;  %p295_p9 = scmp.lt.u32.totalorder %s291_s15, %s488_s0 }
  0x17   :  { %p297_p10 = pnand %p295_p9, %p292_p8 }
  0x19   :  { %300 = shalt.err (!%p297_p10)
}
  0x1a   :  { %s301_s20 = scalar_lea.vmem %s404_s24, 256  ;;  %p306_p12 = scmp.lt.s32.totalorder %s404_s24, %s404_s24 }
  0x1b   :  { %p302_p11 = scmp.ne.s32.totalorder %s404_s24, %s301_s20  ;;  %p307_p13 = scmp.lt.s32.totalorder %s301_s20, %s301_s20 }
  0x1d   :  { %p308_p0 = por %p307_p13, %p306_p12 }
  0x1f   :  { %p309_p1 = pnand %p308_p0, %p302_p11 }
  0x21   :  { %312 = shalt.err (!%p309_p1)
}
  0x22   :  { %25 = dma.hbm_to_vmem [thread:$0]  %s488_s0, 256, %s404_s24, [#allocation3], %s365_s9, %s365_s9, %s366_s10  }
  0x23   :  { %s367_s22 = smov [#allocation7]   ;;  %s313_s27 = scalar_lea.hbm %s490_s2, 512 }
  0x24   :  { %s43_s23 = sshll.u32 %s367_s22, 4  ;;  %p314_p2 = scmp.ne.s32.totalorder %s490_s2, %s313_s27  ;;  %s44_s23 = int_to_ptr.vmem [resolvable:$true] %s43_s23 }
  0x25   :  { %p317_p3 = scmp.lt.u32.totalorder %s313_s27, %s490_s2 }
  0x27   :  { %p319_p4 = pnand %p317_p3, %p314_p2 }
  0x29   :  { %322 = shalt.err (!%p319_p4)
}
  0x2a   :  { %s323_s8 = scalar_lea.vmem %s44_s23, 512  ;;  %p328_p6 = scmp.lt.s32.totalorder %s44_s23, %s44_s23 }
  0x2b   :  { %p324_p5 = scmp.ne.s32.totalorder %s44_s23, %s323_s8  ;;  %p329_p7 = scmp.lt.s32.totalorder %s323_s8, %s323_s8 }
  0x2d   :  { %p330_p8 = por %p329_p7, %p328_p6 }
  0x2f   :  { %p331_p9 = pnand %p330_p8, %p324_p5 }
  0x31   :  { %334 = shalt.err (!%p331_p9)
}
  0x32   :  { %49 = dma.hbm_to_vmem [thread:$0]  %s490_s2, 512, %s44_s23, [#allocation6], %s365_s9, %s365_s9, %s366_s10  }
  0x33   :  { %357 = dma.done.wait [#allocation3], 256  }
  0x34   :  { %358 = vsyncadd [#allocation3], 4294967040 }
  0x35   :  { %359 = dma.done.wait [#allocation6], 768  }
  0x36   :  { %360 = vsyncadd [#allocation6], 4294966528  ;;  %vm78_vm0 = vcmask 261120   ;;  %v67_v0 = vld [vmem:[#allocation7] sm:$0xff]  ;;  %v68_v1 = vld [vmem:[#allocation7 + $0x8] sm:$0xff]  ;;  %s368_s15 = smov [#allocation8]  }
  0x37   :  { %v69_v2 = vld [vmem:[#allocation7 + $0x10] sm:$0xff]  ;;  %v251_v3 = vpack.c.bf16 %v68_v1, %v67_v0  ;;  %v70_v4 = vld [vmem:[#allocation7 + $0x18] sm:$0xff]  ;;  %v65_v5 = vld [vmem:[#allocation2] sm:$0xff]  ;;  %s216_s16 = sshll.u32 %s368_s15, 4  ;;  %s217_s16 = int_to_ptr.vmem [resolvable:$true] %s216_s16 }
  0x38   :  { %v255_v6 = vpack.c.bf16 %v70_v4, %v69_v2  ;;  %248 = vmatprep.mubr.msk.f32.mxu0 %vm78_vm0, %v65_v5  ;;  %v66_v7 = vld [vmem:[#allocation2 + $0x8] sm:$0xff]  ;;  %v229_v8 = vld [vmem:[%s491_s3] ss:$0 sm:$0xff]  ;;  %v160_v11 = vld [vmem:[#allocation5] sm:$0xff]  ;;  %s335_s17 = scalar_lea.vmem %s217_s16, 256  ;;  %p340_p11 = scmp.lt.s32.totalorder %s217_s16, %s217_s16 }
  0x39   :  { %252 = vmatprep.subr.bf16.mxu0 %v251_v3  ;;  %v161_v14 = vld [vmem:[#allocation5 + $0x8] sm:$0xff]  ;;  %v232_v36 = vld [vmem:[%s492_s4] ss:$0 sm:$0xff]  ;;  %p336_p10 = scmp.ne.s32.totalorder %s217_s16, %s335_s17  ;;  %p341_p12 = scmp.lt.s32.totalorder %s335_s17, %s335_s17 }
  0x3a   :  { %254 = vmatpush3.bf16.msra.mxu0 %v251_v3  ;;  %v233_v38 = vld [vmem:[%s493_s5] ss:$0 sm:$0xff] }
  0x3b   :  { %256 = vmatprep.subr.bf16.mxu0 %v255_v6  ;;  %p342_p13 = por %p341_p12, %p340_p11 }
  0x3d   :  { %p343_p0 = pnand %p342_p13, %p336_p10 }
  0x3e   :  { %258 = vmatpush3.bf16.msra.mxu0 %v255_v6 }
  0x41   :  { %249 = vmatmul.mubr.msk.f32.vlgmr.msra.gmra.mrb[0].mxu0 %vm78_vm0, %v66_v7 }
 0x114   :  { %v250_v9 = vpop.f32.mrb[0].mxu0 }
 0x115   :  { %v151_v10 = vpop.f32.mrb[1].mxu0  ;;  %v157_v12 = vadd.f32 %v250_v9, %v229_v8 }
 0x116   :  { %v152_v13 = vadd.f32 %v229_v8, %v151_v10 }
 0x117   :  { %v163_v17 = vadd.f32 %v161_v14, %v157_v12 }
 0x118   :  { %v162_v15 = vadd.f32 %v160_v11, %v152_v13 }
 0x119   :  { %v167_v18 = vsel %vm78_vm0, %v163_v17, 0.0 }
 0x11a   :  { %v164_v16 = vsel %vm78_vm0, %v162_v15, 0.0 }
 0x11b   :  { %165 = vadd.xlane.f32.xlu0 %v164_v16 }
 0x11f   :  { %168 = vadd.xlane.f32.xlu0 %v167_v18 }
 0x1a8   :  { %v166_v19 = vpop.xlane.xlu0 %165 }
 0x1a9   :  { %v171_v20 = vmul.f32 0.03125, %v166_v19 }
 0x1ab   :  { %v173_v21 = vsub.f32 %v162_v15, %v171_v20 }
 0x1ac   :  { %v169_v22 = vpop.xlane.xlu0 %168 }
 0x1ad   :  { %v172_v23 = vmul.f32 0.03125, %v169_v22  ;;  %v175_v24 = vmul.f32 %v173_v21, %v173_v21 }
 0x1af   :  { %v174_v25 = vsub.f32 %v163_v17, %v172_v23  ;;  %v177_v26 = vsel %vm78_vm0, %v175_v24, 0.0 }
 0x1b0   :  { %178 = vadd.xlane.f32.xlu1 %v177_v26 }
 0x1b1   :  { %v176_v27 = vmul.f32 %v174_v25, %v174_v25 }
 0x1b3   :  { %v180_v28 = vsel %vm78_vm0, %v176_v27, 0.0 }
 0x1b4   :  { %181 = vadd.xlane.f32.xlu1 %v180_v28 }
 0x23d   :  { %v179_v29 = vpop.xlane.xlu1 %178 }
 0x23e   :  { %v183_v30 = vmul.f32 0.03125, %v179_v29 }
 0x240   :  { %v185_v31 = vadd.f32 1e-12, %v183_v30 }
 0x241   :  { %v182_v32 = vpop.xlane.xlu1 %181 }
 0x242   :  { %265 = vrsqrt.f32 %v185_v31  ;;  %v184_v33 = vmul.f32 0.03125, %v182_v32 }
 0x244   :  { %v186_v34 = vadd.f32 1e-12, %v184_v33 }
 0x246   :  { %267 = vrsqrt.f32 %v186_v34 }
 0x24c   :  { %v266_v35 = vpop.eup %265 }
 0x24d   :  { %v189_v37 = vmul.f32 %v266_v35, %v173_v21 }
 0x24f   :  { %v198_v39 = vmul.f32 %v232_v36, %v189_v37 }
 0x250   :  { %v268_v40 = vpop.eup %267 }
 0x251   :  { %v190_v41 = vmul.f32 %v268_v40, %v174_v25  ;;  %v207_v42 = vadd.f32 %v233_v38, %v198_v39 }
 0x253   :  { %v199_v43 = vmul.f32 %v232_v36, %v190_v41  ;;  %209 = vst.msk [vmem:[#allocation8] sm:$0xff] %vm78_vm0, %v207_v42 }
 0x255   :  { %v208_v44 = vadd.f32 %v233_v38, %v199_v43 }
 0x257   :  { %210 = vst.msk [vmem:[#allocation8 + $0x8] sm:$0xff] %vm78_vm0, %v208_v44 }
 0x258   :  { %346 = shalt.err (!%p343_p0)
}
 0x259   :  { %s347_s18 = scalar_lea.hbm %s494_s6, 256 }
 0x25a   :  { %p348_p1 = scmp.ne.s32.totalorder %s494_s6, %s347_s18  ;;  %p351_p2 = scmp.lt.u32.totalorder %s347_s18, %s494_s6 }
 0x25c   :  { %p353_p3 = pnand %p351_p2, %p348_p1 }
 0x25e   :  { %356 = shalt.err (!%p353_p3)
}
 0x25f   :  { %222 = dma.vmem_to_hbm [thread:$0]  %s217_s16, 256, %s494_s6, [#allocation4], %s365_s9, %s365_s9, %s366_s10  }
 0x260   :  { %361 = dma.done.wait [#allocation4], 256  }
 0x261   :  { %362 = vsyncadd [#allocation4], 4294967040 }
 0x262   :  { %226 = vsyncpa [#allocation3], 1 }
 0x263   :  { %227 = vsyncpa [#allocation6], 1 }
 0x264   :  { %228 = vsyncpa [#allocation4], 1 }

</bundles_post_ra>
